<compile_context>
chip_gen: v5e
topology: v5e:2x2
jax: 0.10.0
libtpu: 0.0.40
codegen_flags: <defaults>
</compile_context>

<pallas_src>
import functools

import jax
import jax.numpy as jnp
from jax.experimental import pallas as pl
from jax.experimental.pallas import tpu as pltpu

D_IN = 32            # backbone input feature dim
D_OUT = 32           # backbone output feature dim
FOLD = 4             # rows folded into the lane dim (4 * 32 = 128 lanes)
ALIGN = 8 * FOLD     # pad rows to a multiple of 32 -> folded rows multiple of 8
MAX_TILE_LINEAR = 2048   # folded rows / grid step, unmasked path (~2 MiB VMEM)
MAX_TILE_MASKED = 1024   # folded rows / grid step, masked path  (~1.6 MiB VMEM)


def _round_up(n, m):
    return ((n + m - 1) // m) * m


def _plan_fold(total_rows, max_tile):
    """Tile size / folded-row count for a flat [total_rows, D_IN] slab.

    Rows are padded only to a multiple of 32 (so folded rows are a multiple of
    8); the trailing grid block may be partial (Pallas masks OOB writes).  The
    tile is chosen so the 'parallel' grid axis has >= 4 steps when possible
    (keeps both v7x TensorCores busy) without exceeding `max_tile`.
    """
    pad = (-total_rows) % ALIGN
    r0 = (total_rows + pad) // FOLD                     # folded rows (mult of 8)
    tile_m = max(8, min(max_tile, _round_up(-(-r0 // 4), 8)))
    return tile_m, r0, pad


# ---------------------------------------------------------------------------
# Kernels
# ---------------------------------------------------------------------------

def _linear_kernel(x_ref, w_ref, b_ref, o_ref):
    # x: (TILE_M, 128) bf16, w: (128, 128) bf16, b: (1, 128) f32, o: (TILE_M, 128) bf16
    y = jnp.dot(x_ref[...], w_ref[...], preferred_element_type=jnp.float32)
    o_ref[...] = (y + b_ref[...]).astype(o_ref.dtype)


def _masked_kernel(x_ref, w_ref, b_ref, e_ref, m_ref, o_ref, y_ref):
    # grid = (row_tiles, n_masks); mask axis innermost ("arbitrary").
    # x: (TILE_M, 128) bf16      w: (128, 128) bf16      b: (1, 128) f32
    # e: (FOLD, 128) f32  lane-group expander = kron(I_FOLD, ones(1, D_OUT))
    # m: (1, TILE_M, FOLD) f32 compact per-row mask
    # o: (1, TILE_M, 128) bf16   y_ref: (TILE_M, 128) f32 VMEM scratch
    @pl.when(pl.program_id(1) == 0)
    def _():
        # x @ W + b computed ONCE per row tile, shared across all masks.
        y_ref[...] = (jnp.dot(x_ref[...], w_ref[...],
                              preferred_element_type=jnp.float32) + b_ref[...])

    # Expand the compact (TILE_M, FOLD) mask to 128 lanes via a tiny matmul on
    # the otherwise-idle MXU (replaces the old VPU where/add expansion chain).
    m_exp = jnp.dot(m_ref[0], e_ref[...], preferred_element_type=jnp.float32)
    o_ref[0] = (y_ref[...] * m_exp).astype(o_ref.dtype)


# ---------------------------------------------------------------------------
# pallas_call wrappers
# ---------------------------------------------------------------------------

@functools.partial(jax.jit, static_argnames=("tile_m",))
def _linear_call(xf, w, b, *, tile_m):
    r, lanes_in = xf.shape
    lanes_out = w.shape[1]
    grid_m = pl.cdiv(r, tile_m)
    flops = 2 * r * lanes_in * lanes_out
    bytes_accessed = (r * lanes_in * xf.dtype.itemsize      # x (bf16)
                      + r * lanes_out * 2                    # out (bf16)
                      + w.size * w.dtype.itemsize
                      + b.size * b.dtype.itemsize)
    return pl.pallas_call(
        _linear_kernel,
        out_shape=jax.ShapeDtypeStruct((r, lanes_out), jnp.bfloat16),
        grid_spec=pltpu.PrefetchScalarGridSpec(
            num_scalar_prefetch=0,
            grid=(grid_m,),
            in_specs=[
                pl.BlockSpec((tile_m, lanes_in), lambda i: (i, 0)),
                pl.BlockSpec((lanes_in, lanes_out), lambda i: (0, 0)),
                pl.BlockSpec((1, lanes_out), lambda i: (0, 0)),
            ],
            out_specs=pl.BlockSpec((tile_m, lanes_out), lambda i: (i, 0)),
        ),
        compiler_params=pltpu.CompilerParams(
            dimension_semantics=("parallel",)),
        cost_estimate=pl.CostEstimate(flops=flops, transcendentals=0,
                                      bytes_accessed=bytes_accessed),
    )(xf, w, b)


@functools.partial(jax.jit, static_argnames=("tile_m",))
def _masked_multi_call(xf, w, b, expand, mf, *, tile_m):
    r, lanes_in = xf.shape
    lanes_out = w.shape[1]
    n_masks, _, fold = mf.shape
    grid_m = pl.cdiv(r, tile_m)
    flops = (2 * r * lanes_in * lanes_out                      # x @ W (once per tile)
             + n_masks * (2 * r * fold * lanes_out             # mask expand matmul
                          + r * lanes_out))                    # mask multiply
    bytes_accessed = (r * lanes_in * xf.dtype.itemsize         # x (bf16)
                      + n_masks * r * fold * mf.dtype.itemsize  # compact masks
                      + n_masks * r * lanes_out * 2            # outs (bf16)
                      + w.size * w.dtype.itemsize
                      + b.size * b.dtype.itemsize
                      + expand.size * expand.dtype.itemsize)
    return pl.pallas_call(
        _masked_kernel,
        out_shape=jax.ShapeDtypeStruct((n_masks, r, lanes_out), jnp.bfloat16),
        grid_spec=pltpu.PrefetchScalarGridSpec(
            num_scalar_prefetch=0,
            grid=(grid_m, n_masks),
            in_specs=[
                pl.BlockSpec((tile_m, lanes_in), lambda i, n: (i, 0)),
                pl.BlockSpec((lanes_in, lanes_out), lambda i, n: (0, 0)),
                pl.BlockSpec((1, lanes_out), lambda i, n: (0, 0)),
                pl.BlockSpec((FOLD, lanes_out), lambda i, n: (0, 0)),
                pl.BlockSpec((1, tile_m, fold), lambda i, n: (n, i, 0)),
            ],
            out_specs=pl.BlockSpec((1, tile_m, lanes_out), lambda i, n: (n, i, 0)),
            scratch_shapes=[pltpu.VMEM((tile_m, lanes_out), jnp.float32)],
        ),
        compiler_params=pltpu.CompilerParams(
            dimension_semantics=("parallel", "arbitrary")),
        cost_estimate=pl.CostEstimate(flops=flops, transcendentals=0,
                                      bytes_accessed=bytes_accessed),
    )(xf, w, b, expand, mf)


# ---------------------------------------------------------------------------
# Backbone + wrapper
# ---------------------------------------------------------------------------

class PallasBackbone:
    """Masked linear backbone; matmul + mask hot path runs in Pallas (bf16 I/O)."""

    def __init__(self, key):
        kw, kb = jax.random.split(key)
        self.w = (jax.random.normal(kw, (D_IN, D_OUT), jnp.float32)
                  / jnp.sqrt(jnp.float32(D_IN)))
        self.b = jax.random.normal(kb, (1, D_OUT), jnp.float32) * 0.1
        # Lane-dense folded parameters (resident constants, built once):
        #   block-diagonal bf16 W (FOLD copies on the diagonal), f32 tiled bias.
        self.w_fold = jnp.kron(jnp.eye(FOLD, dtype=jnp.float32),
                               self.w).astype(jnp.bfloat16)           # (128, 128)
        self.b_fold = jnp.tile(self.b, (1, FOLD))                      # (1, 128) f32
        # Lane-group mask expander: (TILE_M, FOLD) @ expand -> (TILE_M, 128).
        self.mask_expand = jnp.kron(jnp.eye(FOLD, dtype=jnp.float32),
                                    jnp.ones((1, D_OUT), jnp.float32))  # (4, 128)


class MultiSeqWrapper:
    """JAX/Pallas port of src/utils/wrappers.py::MultiSeqWrapper."""

    def __init__(self, backbone):
        self.backbone = backbone

    # ---- unmasked path: all sequences fused into one pallas_call ----------
    def _forward_nomask(self, x):
        bb = self.backbone
        shapes = [xi.shape for xi in x]
        rows_per = [s[0] * s[1] for s in shapes]
        x2d = jnp.concatenate(
            [xi.reshape(-1, D_IN) for xi in x], axis=0).astype(jnp.bfloat16)
        total = x2d.shape[0]

        tile_m, r0, pad = _plan_fold(total, MAX_TILE_LINEAR)
        if pad:  # <= 31 rows of padding; fold-reshape alignment only
            x2d = jnp.pad(x2d, ((0, pad), (0, 0)))
        xf = x2d.reshape(r0, FOLD * D_IN)

        yf = _linear_call(xf, bb.w_fold, bb.b_fold, tile_m=tile_m)
        y2d = yf.reshape(r0 * FOLD, D_OUT)[:total]

        outs, off = [], 0
        for (B, S, _), nrows in zip(shapes, rows_per):
            outs.append(y2d[off:off + nrows].reshape(B, S, D_OUT))
            off += nrows
        return outs

    # ---- masked path: one pallas_call per sequence, masks on a grid axis --
    def _forward_masked_seq(self, xi, mi):
        bb = self.backbone
        if len(mi) == 0:
            return []
        B, S, _ = xi.shape
        rows = B * S
        n_masks = len(mi)

        x2d = xi.reshape(rows, D_IN).astype(jnp.bfloat16)
        m2d = jnp.stack(
            [m.reshape(rows).astype(jnp.float32) for m in mi], axis=0)  # (n_masks, rows)

        tile_m, r0, pad = _plan_fold(rows, MAX_TILE_MASKED)
        if pad:  # <= 31 rows; zero masks on the pad rows
            x2d = jnp.pad(x2d, ((0, pad), (0, 0)))
            m2d = jnp.pad(m2d, ((0, 0), (0, pad)))
        xf = x2d.reshape(r0, FOLD * D_IN)
        mf = m2d.reshape(n_masks, r0, FOLD)

        yf = _masked_multi_call(xf, bb.w_fold, bb.b_fold, bb.mask_expand, mf,
                                tile_m=tile_m)
        y = yf.reshape(n_masks, r0 * FOLD, D_OUT)[:, :rows]
        y = y.reshape(n_masks, B, S, D_OUT)
        return [y[n] for n in range(n_masks)]

    def __call__(self, x, masks=None):
        # x: list of [B, S_i, D_IN] arrays; masks: list (per seq) of lists of [B, S_i]
        if masks is None:
            return self._forward_nomask(x)
        outs = [[] for _ in x]
        for i, (xi, mi) in enumerate(zip(x, masks)):
            outs[i] += self._forward_masked_seq(xi, mi)
        return outs


# ---------------------------------------------------------------------------
# Reference + self-check
# ---------------------------------------------------------------------------

def _ref_backbone(backbone, x, masks=None):
    # Mirror the kernel's bf16 input/weight quantization; accumulate in f32.
    xq = x.astype(jnp.bfloat16).astype(jnp.float32)
    wq = backbone.w.astype(jnp.bfloat16).astype(jnp.float32)
    y = jnp.einsum("bsd,dh->bsh", xq, wq) + backbone.b[0]
    if masks is not None:
        y = y * masks[..., None]
    return y


if __name__ == "__main__":
    key = jax.random.PRNGKey(0)
    k_bb, k_x0, k_x1, k_m = jax.random.split(key, 4)

    backbone = PallasBackbone(k_bb)
    model = MultiSeqWrapper(backbone)

    B = 2
    seq_lens = [8, 16]  # two "sequences" of different lengths
    x_list = [
        jax.random.normal(k_x0, (B, seq_lens[0], D_IN), jnp.float32),
        jax.random.normal(k_x1, (B, seq_lens[1], D_IN), jnp.float32),
    ]
    km = jax.random.split(k_m, 3)
    masks_list = [
        [  # two multimasks for seq length 8
            (jax.random.uniform(km[0], (B, seq_lens[0])) > 0.5).astype(jnp.float32),
            (jax.random.uniform(km[1], (B, seq_lens[0])) > 0.5).astype(jnp.float32),
        ],
        [  # one mask for seq length 16
            (jax.random.uniform(km[2], (B, seq_lens[1])) > 0.5).astype(jnp.float32),
        ],
    ]

    # Path 1: no masks -> flat list of outputs (single fused pallas_call)
    outs_flat = model(x_list)
    outs_flat = [jax.block_until_ready(o) for o in outs_flat]

    # Path 2: with masks -> nested list (one pallas_call per sequence,
    # masks amortized over a grid axis)
    outs_nested = model(x_list, masks=masks_list)
    outs_nested = [[jax.block_until_ready(o) for o in oi] for oi in outs_nested]

    # Correctness check against a pure-JAX reference (bf16 I/O tolerance).
    ok = True
    for xi, oi in zip(x_list, outs_flat):
        ok &= bool(jnp.allclose(oi.astype(jnp.float32),
                                _ref_backbone(backbone, xi), atol=5e-2))
    for xi, mi, oi in zip(x_list, masks_list, outs_nested):
        ok &= len(mi) == len(oi)
        for mij, oij in zip(mi, oi):
            ok &= bool(jnp.allclose(oij.astype(jnp.float32),
                                    _ref_backbone(backbone, xi, mij), atol=5e-2))

    assert ok, "Pallas backbone mismatch vs JAX reference"
    print("KERNEL_OK")
</pallas_src>

<mosaic_0001>
module attributes {stable_mosaic.version = 11 : i64} {
  func.func @_linear_kernel(%arg0: i32, %arg1: memref<8x128xbf16, #tpu.memory_space<vmem>>, %arg2: memref<128x128xbf16, #tpu.memory_space<vmem>>, %arg3: memref<1x128xf32, #tpu.memory_space<vmem>>, %arg4: memref<8x128xbf16, #tpu.memory_space<vmem>>) attributes {dimension_semantics = [#tpu.dimension_semantics<parallel>], iteration_bounds = array<i64: 2>, scalar_prefetch = 0 : i64, scratch_operands = 0 : i64, tpu.core_type = #tpu.core_type<tc>, window_params = [{transform_indices = @transform_0, window_bounds = array<i64: 8, 128>}, {pipeline_mode = #tpu.pipeline_mode<synchronous>, transform_indices = @transform_1, window_bounds = array<i64: 128, 128>}, {pipeline_mode = #tpu.pipeline_mode<synchronous>, transform_indices = @transform_2, window_bounds = array<i64: 1, 128>}, {transform_indices = @transform_3, window_bounds = array<i64: 8, 128>}]} {
    %c0 = arith.constant 0 : index
    %c0_0 = arith.constant 0 : index
    %0 = vector.load %arg1[%c0, %c0_0] : memref<8x128xbf16, #tpu.memory_space<vmem>>, vector<8x128xbf16>
    %c0_1 = arith.constant 0 : index
    %c0_2 = arith.constant 0 : index
    %1 = vector.load %arg2[%c0_1, %c0_2] : memref<128x128xbf16, #tpu.memory_space<vmem>>, vector<128x128xbf16>
    %cst = arith.constant dense<0.000000e+00> : vector<8x128xf32>
    %2 = tpu.matmul %0, %1, %cst {dimension_numbers = #tpu.dot_dimension_numbers<[1], [0], [0], [1], [0, 0, 1, 1], [], []>} : vector<8x128xbf16>, vector<128x128xbf16>, vector<8x128xf32> -> vector<8x128xf32>
    %c0_3 = arith.constant 0 : index
    %c0_4 = arith.constant 0 : index
    %3 = vector.load %arg3[%c0_3, %c0_4] : memref<1x128xf32, #tpu.memory_space<vmem>>, vector<1x128xf32>
    %4 = vector.broadcast %3 : vector<1x128xf32> to vector<8x128xf32>
    %5 = arith.addf %2, %4 : vector<8x128xf32>
    %6 = arith.truncf %5 : vector<8x128xf32> to vector<8x128xbf16>
    %c0_5 = arith.constant 0 : index
    %c0_6 = arith.constant 0 : index
    %7 = vector.load %arg4[%c0_5, %c0_6] : memref<8x128xbf16, #tpu.memory_space<vmem>>, vector<8x128xbf16>
    tpu.vector_store %arg4[%c0_5, %c0_6], %6 {strides = array<i32>} : memref<8x128xbf16, #tpu.memory_space<vmem>>, vector<8x128xbf16>,
    return
  }
  func.func @transform_0(%arg0: i32) -> (i32, i32) {
    %c0_i32 = arith.constant 0 : i32
    %c0_i32_0 = arith.constant 0 : i32
    return %arg0, %c0_i32 : i32, i32
  }
  func.func @transform_1(%arg0: i32) -> (i32, i32) {
    %c0_i32 = arith.constant 0 : i32
    %c0_i32_0 = arith.constant 0 : i32
    %c0_i32_1 = arith.constant 0 : i32
    return %c0_i32, %c0_i32_0 : i32, i32
  }
  func.func @transform_2(%arg0: i32) -> (i32, i32) {
    %c0_i32 = arith.constant 0 : i32
    %c0_i32_0 = arith.constant 0 : i32
    %c0_i32_1 = arith.constant 0 : i32
    return %c0_i32, %c0_i32_0 : i32, i32
  }
  func.func @transform_3(%arg0: i32) -> (i32, i32) {
    %c0_i32 = arith.constant 0 : i32
    %c0_i32_0 = arith.constant 0 : i32
    return %arg0, %c0_i32 : i32, i32
  }
}

</mosaic_0001>

<bundles_post_ra>
// kernel: _linear_call.1
= control target key start
LH: loop header
LB: loop body
LE: loop exit
PB: predicated region body
PF: predicated region fallthrough
CT: control target
= control target key end

     0   :  { %8 = vsyncpa [#allocation3], 0  ;;  %s793_s0 = inlined_call_operand.hbm [shape: bf16[16,128], index: 0, kind: input, shape index: {}]   ;;  %s794_s1 = inlined_call_operand.hbm [shape: bf16[128,128], index: 1, kind: input, shape index: {}]   ;;  %s795_s2 = inlined_call_operand.vmem [shape: f32[1,128], index: 2, kind: input, shape index: {}]   ;;  %s796_s3 = inlined_call_operand.hbm [shape: bf16[16,128], index: 3, kind: output, shape index: {}]  }
   0x1   :  { %10 = vsyncpa [#allocation3 + $0x1], 0 }
   0x2   :  { %11 = vsyncpa [#allocation6], 0 }
   0x3   :  { %12 = vsyncpa [#allocation4], 0 }
   0x4   :  { %14 = vsyncpa [#allocation4 + $0x1], 0  ;;  %s654_s12 = smov 0   ;;  %s656_s13 = smov 0  }
   0x5   :  { %s658_s14 = smov 0   ;;  %s660_s15 = smov 0  }
   0x6 LB: > { %s130_s18 = sshll.u32 %s794_s1, 4  ;;  %s678_s19 = sadd.s32 4294967295, %s629_s15   ;;  %s629_s15 = sphi %s660_s15, %s806_s15   ;;  %s625_s14 = sphi %s658_s14, %s805_s14   ;;  %s621_s13 = sphi %s656_s13, %s804_s13   ;;  %s617_s12 = sphi %s654_s12, %s803_s12   ;;  %s131_s18 = int_to_ptr.hbm [resolvable:$true] %s130_s18 }
   0x7   : > { %p386_p0 = scmp.ge.s32.totalorder %s629_s15, 1  ;;  %p41_p1 = scmp.eq.s32.totalorder %s678_s19, 0 }
   0x8   : > { %p119_p2 = scmp.lt.s32.totalorder %s629_s15, 3  ;;  %s631_s21 = smov [#allocation5]  }
   0x9   : > { %s132_s22 = sshll.u32 %s631_s21, 4  ;;  %s632_s23 = smov 64   ;;  %s133_s22 = int_to_ptr.vmem [resolvable:$true] %s132_s22 }
   0xa   : > { %p683_p3 = pnand %p386_p0, %p119_p2  ;;  %s633_s24 = smov 4  }
   0xb   : > { %s385_s25 = sadd.s32 4294967294, %s629_s15   ;;  %s694_s26 = sadd.s32 1, %s629_s15  }
   0xc   : > { %p447_p4 = pneg %p683_p3  ;;  %s27_s27 = sadd.s32 1, %s625_s14 }
   0xd   : > { %s24_s28 = ssub.s32 %s629_s15, %s694_s26  ;;  %p34_p7 = scmp.ne.s32.totalorder %s625_s14, %s621_s13 }
   0xe   : > { %p448_p6 = pnand %p447_p4, %p41_p1  ;;  %p25_p8 = scmp.eq.s32.totalorder %s24_s28, 0 }
   0xf   : > { %p35_p9 = scmp.eq.s32.totalorder %s629_s15, 0  ;;  %p40_p10 = scmp.ne.s32.totalorder %s621_s13, %s617_s12 }
  0x10   : > { %450 = dma.hbm_to_vmem [thread:$0]  (!%p448_p6), %s131_s18, 1024, %s133_s22, [#allocation6], %s632_s23, %s632_s23, %s633_s24  }
  0x11   : > { %p106_p11 = scmp.eq.s32.totalorder %s678_s19, 1  ;;  %p710_p12 = por %p41_p1, %p40_p10 }
  0x12   : > { %s706_s29 = scalar_select %p25_p8, %s625_s14, %s27_s27  }
  0x13   : > { %p714_p13 = por %p106_p11, %p34_p7  ;;  %p112_p0 = scmp.eq.s32.totalorder %s385_s25, 1 }
  0x14   : > { %p36_p2 = por %p35_p9, %p34_p7  ;;  %s149_s5 = sand.u32 1, %s625_s14  }
  0x15   : > { %p719_p4 = por %p112_p0, %p40_p10  ;;  %p460_p6 = scmp.lt.s32.totalorder %s629_s15, 2 }
  0x16   : > { %s389_s7 = sshll.u32 %s149_s5, 2  ;;  %s390_s8 = sshll.u32 %s629_s15, 2 }
  0x17   : > { %s157_s11 = scalar_lea.hbm %s793_s0, %s390_s8  ;;  %s153_s17 = scalar_lea.vmem [#allocation2], %s389_s7 }
  0x18   : > { %s159_s16 = sshll.u32 %s157_s11, 4  ;;  %s161_s18 = sshll.u32 %s153_s17, 4  ;;  %s160_s16 = int_to_ptr.hbm [resolvable:$true] %s159_s16  ;;  %s162_s18 = int_to_ptr.vmem [resolvable:$true] %s161_s18 }
  0x19   : > { %p728_p8 = pnand %p460_p6, %p36_p2  ;;  %s150_s22 = scalar_lea.sflag [#allocation3], %s149_s5 }
  0x1a   : > { %s529_s23 = sshra.s32 %s160_s16, 4  ;;  %s536_s28 = scalar_lea.hbm %s793_s0, 8  ;;  %s530_s23 = int_to_ptr.hbm [resolvable:$true] %s529_s23 }
  0x1b   : > { %s531_s24 = scalar_lea.hbm %s530_s23, 4  ;;  %p533_p9 = pneg %p728_p8 }
  0x1c   : > { %p532_p7 = scmp.ne.s32.totalorder %s530_s23, %s531_s24  ;;  %p537_p0 = scmp.lt.s32.totalorder %s530_s23, %s793_s0 }
  0x1d   : > { %p538_p2 = scmp.lt.s32.totalorder %s536_s28, %s531_s24 }
  0x1e   : > { %p534_p10 = pnand %p533_p9, %p532_p7 }
  0x1f   : > { %p539_p6 = por %p538_p2, %p537_p0 }
  0x20   : > { %p535_p11 = pneg %p534_p10 }
  0x22   : > { %p540_p5 = pnand %p539_p6, %p535_p11 }
  0x24   : > { %543 = shalt.err (!%p540_p5)
}
  0x25   : > { %454 = dma.hbm_to_vmem [thread:$0]  (!%p728_p8), %s160_s16, 64, %s162_s18, %s150_s22  }
  0x26   : > { %170 = sbr.rel (%p683_p3) target bundleno = 212 (0xd4), region = 32  ;;  %s745_s5 = sand.u32 (!%p683_p3), 1, %s621_s13  }
  0x27   : > { %s392_s9 = sshll.u32 (!%p683_p3), %s745_s5, 2  ;;  %s173_s10 = scalar_lea.sflag (!%p683_p3), [#allocation3], %s745_s5 }
  0x28   : > { %s176_s11 = scalar_lea.vmem (!%p683_p3), [#allocation2], %s392_s9 }
  0x2b   : > { %604 = dma.done.wait (%p710_p12), %s173_s10, 64  }
  0x2c   : > { %606 = vsyncadd (%p710_p12), %s173_s10, 4294967232 }
  0x2d   : > { %608 = dma.done.wait (%p41_p1), [#allocation6], 1024  }
  0x2e   : > { %610 = vsyncadd (%p41_p1), [#allocation6], 4294966272  ;;  %v438_v0 = vld [vmem:[#allocation5 + $0x38] sm:$0xff]  ;;  %v437_v1 = vld [vmem:[#allocation5 + $0x30] sm:$0xff]  ;;  %s428_s20 = sshll.u32 %s678_s19, 2  ;;  %s204_s22 = scalar_lea.vmem [#allocation7], %s392_s9 }
  0x2f   : > { %274 = vmatpush.bf16.msra.mxu0 %v438_v0  ;;  %v436_v2 = vld [vmem:[#allocation5 + $0x28] sm:$0xff]  ;;  %v435_v3 = vld [vmem:[#allocation5 + $0x20] sm:$0xff]  ;;  %v434_v4 = vld [vmem:[#allocation5 + $0x18] sm:$0xff]  ;;  %s300_s21 = scalar_lea.hbm %s796_s3, %s428_s20  ;;  %s302_s23 = sshll.u32 %s204_s22, 4  ;;  %s303_s23 = int_to_ptr.vmem [resolvable:$true] %s302_s23 }
  0x30   : > { %v433_v5 = vld [vmem:[#allocation5 + $0x10] sm:$0xff]  ;;  %v432_v6 = vld [vmem:[#allocation5 + $0x8] sm:$0xff]  ;;  %v431_v7 = vld [vmem:[#allocation5] sm:$0xff]  ;;  %s304_s24 = sshll.u32 %s300_s21, 4  ;;  %s290_s25 = scalar_lea.sflag [#allocation4], %s745_s5  ;;  %s305_s24 = int_to_ptr.hbm [resolvable:$true] %s304_s24 }
  0x31   : > { %v205_v8 = vld [vmem:[%s176_s11] sm:$0xf]  ;;  %s573_s19 = sshra.s32 %s305_s24, 4  ;;  %s579_s8 = scalar_lea.hbm %s796_s3, 8  ;;  %s574_s19 = int_to_ptr.hbm [resolvable:$true] %s573_s19 }
  0x32   : > { %v498_v9 = vld [vmem:[%s795_s2] ss:$0 sm:$0xff]  ;;  %s575_s27 = scalar_lea.hbm %s574_s19, 4  ;;  %p580_p12 = scmp.lt.s32.totalorder %s574_s19, %s796_s3 }
  0x33   : > { %275 = vmatpush.bf16.msra.mxu0 %v437_v1  ;;  %p576_p1 = scmp.ne.s32.totalorder %s574_s19, %s575_s27  ;;  %p581_p8 = scmp.lt.s32.totalorder %s579_s8, %s575_s27 }
  0x35   : > { %p577_p3 = pnand %p576_p1, %p714_p13  ;;  %p582_p7 = por %p581_p8, %p580_p12 }
  0x37   : > { %276 = vmatpush.bf16.msra.mxu0 %v436_v2  ;;  %p578_p5 = pneg %p577_p3 }
  0x39   : > { %p583_p9 = pnand %p582_p7, %p578_p5 }
  0x3b   : > { %277 = vmatpush.bf16.msra.mxu0 %v435_v3 }
  0x3f   : > { %278 = vmatpush.bf16.msra.mxu0 %v434_v4 }
  0x43   : > { %279 = vmatpush.bf16.msra.mxu0 %v433_v5 }
  0x47   : > { %280 = vmatpush.bf16.msra.mxu0 %v432_v6 }
  0x4b   : > { %281 = vmatpush.bf16.msra.mxu0 %v431_v7 }
  0x4e   : > { %282 = vmatmul.bf16.vlgmr.msra.gmra.mxu0 %v205_v8 }
  0xcb   : > { %v283_v10 = vpop.f32.mrf.mxu0 }
  0xcc   : > { %v284_v11 = vadd.f32 %v498_v9, %v283_v10 }
  0xce   : > { %v287_v12 = vpack.c.bf16 %v284_v11, %v284_v11 }
  0xd0   : > { %288 = vst [vmem:[%s204_s22] sm:$0xf] %v287_v12 }
  0xd1   : > { %586 = shalt.err (!%p583_p9)
}
  0xd2   : > { %445 = dma.vmem_to_hbm [thread:$0]  (%p714_p13), %s303_s23, 64, %s305_s24, %s290_s25  }
  0xd3   : > { %v285_v13 = vpop.f32.mrf.mxu0 }
  0xd4 PF: > { %s316_s5 = sand.u32 1, %s617_s12   ;;  %p802_p10 = scmp.ge.s32.totalorder %s629_s15, 2 }
  0xd5   : > { %s317_s11 = scalar_lea.sflag [#allocation4], %s316_s5 }
  0xd6   : > { %p456_p11 = pnand %p802_p10, %p719_p4 }
  0xd8   : > { %p457_p0 = pneg %p456_p11 }
  0xda   : > { %612 = dma.done.wait (%p457_p0), %s317_s11, 64  }
  0xdb   : > { %614 = vsyncadd (%p457_p0), %s317_s11, 4294967232  ;;  %p17_p2 = scmp.ge.s32.totalorder %s694_s26, 4   ;;  %s803_s12 = smov %s621_s13 }
  0xdc   : > { %s804_s13 = smov %s625_s14  ;;  %s805_s14 = smov %s706_s29 }
  0xdd   : > { %s806_s15 = smov %s694_s26  ;;  %19 = sbr.rel (!%p17_p2) target bundleno = 6 (0x6), region = 81 }
  0xe2   :  { %323 = vsyncpa [#allocation3], 1 }
  0xe3   :  { %325 = vsyncpa [#allocation3 + $0x1], 1 }
  0xe4   :  { %326 = vsyncpa [#allocation6], 1 }
  0xe5   :  { %327 = vsyncpa [#allocation4], 1 }
  0xe6   :  { %329 = vsyncpa [#allocation4 + $0x1], 1 }

</bundles_post_ra>
